<compile_context>
chip_gen: v7x
topology: tpu7x:2x2x1
jax: 0.10.0
libtpu: 0.0.40
codegen_flags: <defaults>
</compile_context>

<pallas_src>
import jax
import jax.numpy as jnp
from jax.experimental import pallas as pl
from jax.experimental.pallas import tpu as pltpu

_HIGHEST = jax.lax.Precision.HIGHEST


def _round_up(x, m):
    return (x + m - 1) // m * m


# ---------------------------------------------------------------------------
# Kernel: out_tile = h1_tile(bf16) @ W23_tile(bf16) + b23_tile(f32)
# ---------------------------------------------------------------------------
def fused_decoder_kernel(h1_ref, w23_ref, b23_ref, out_ref):
    out_ref[...] = (
        jnp.dot(h1_ref[...], w23_ref[...], preferred_element_type=jnp.float32)
        + b23_ref[...]
    ).astype(out_ref.dtype)


# ---------------------------------------------------------------------------
# Per-generation VMEM budgeting
# ---------------------------------------------------------------------------
def _vmem_capacity_bytes(default=64 * 1024 * 1024):
    try:
        info = pltpu.get_tpu_info()
        for name in ("vmem_capacity_bytes", "vmem_size_bytes", "vmem_bytes"):
            v = getattr(info, name, None)
            if v:
                return int(v)
    except Exception:
        pass
    return default  # conservative (v7x-sized) fallback


def _vmem_budgets():
    cap = _vmem_capacity_bytes()
    # Scoped limit: leave ~16 MiB for Mosaic internal scratch / residents.
    limit = max(32 * 1024 * 1024, min(cap - 16 * 1024 * 1024, 112 * 1024 * 1024))
    # Budget for the streamed, double-buffered tiles (extra 8 MiB headroom).
    stream_budget = max(16 * 1024 * 1024, limit - 8 * 1024 * 1024)
    return limit, stream_budget


# ---------------------------------------------------------------------------
# Tile-size selection (no full-extent fallbacks — inputs are padded instead)
# ---------------------------------------------------------------------------
def _pick_batch_tile(b, target=128):
    return min(_round_up(b, 8), target)


def _pick_n_tile(n_pad128, k_rows, tb, stream_budget, target=4096):
    # Double-buffered streamed bytes per output lane column:
    #   bf16 W23 rows + f32 bias row + f32 out rows  (h1 tile is tiny).
    bytes_per_col = 2 * (2 * k_rows + 4 + 4 * tb)
    cap = min(n_pad128, target, max(128, stream_budget // bytes_per_col))
    cap = max(128, (cap // 128) * 128)
    if n_pad128 <= cap:
        return n_pad128
    tn = cap
    while tn >= 128:
        if n_pad128 % tn == 0:
            return tn
        tn -= 128
    return 128  # unreachable: n_pad128 is a multiple of 128


# ---------------------------------------------------------------------------
# Wrapper
# ---------------------------------------------------------------------------
def latent_decoder_forward(latent, folded_params, dim_m, out_dtype=jnp.float32):
    """Equivalent of LatentDecoderLargeT5NormFF.forward (folded weights)."""
    w1, b1, w23, b23 = folded_params
    B, _ = latent.shape
    s10 = w1.shape[1]            # 10 * set_input_size
    N = w23.shape[1]             # set_input_size * dim_m
    seq = N // dim_m

    # Prologue in plain XLA (negligible FLOPs); bf16 operand for the MXU.
    h1 = (jnp.dot(latent, w1, precision=_HIGHEST) + b1).astype(jnp.bfloat16)

    vmem_limit, stream_budget = _vmem_budgets()
    TB = _pick_batch_tile(B)
    B_pad = _round_up(B, TB)
    N_pad = _round_up(N, 128)
    TN = _pick_n_tile(N_pad, s10, TB, stream_budget)

    # Zero-pad to tile multiples (wrapper-side plumbing; sliced off below).
    if B_pad != B:
        h1 = jnp.pad(h1, ((0, B_pad - B), (0, 0)))
    if N_pad != N:
        w23 = jnp.pad(w23, ((0, 0), (0, N_pad - N)))
        b23 = jnp.pad(b23, ((0, 0), (0, N_pad - N)))

    # Grid: (N tiles, batch tiles).  Batch is innermost so each W23/b23 tile
    # (the dominant HBM stream) is fetched once and reused across all batch
    # tiles; both axes are independent so either can shard across TCs.
    grid = (N_pad // TN, B_pad // TB)

    out_flat = pl.pallas_call(
        fused_decoder_kernel,
        out_shape=jax.ShapeDtypeStruct((B_pad, N_pad), out_dtype),
        grid=grid,
        in_specs=[
            pl.BlockSpec((TB, s10), lambda n, b: (b, 0)),   # h1  (bf16, small)
            pl.BlockSpec((s10, TN), lambda n, b: (0, n)),   # W23 (bf16, streamed)
            pl.BlockSpec((1, TN), lambda n, b: (0, n)),     # b23 (f32, streamed)
        ],
        out_specs=pl.BlockSpec((TB, TN), lambda n, b: (b, n)),
        compiler_params=pltpu.CompilerParams(
            dimension_semantics=("parallel", "parallel"),
            vmem_limit_bytes=vmem_limit,
        ),
    )(h1, w23, b23)

    # Lane-dense (B, S*dim_m) slab -> (B, S, dim_m) view is free plumbing.
    return out_flat[:B, :N].reshape(B, seq, dim_m)


# ---------------------------------------------------------------------------
# Ahead-of-time weight fold:  grow_sequence ∘ grow_tokens  ->  one matmul
# ---------------------------------------------------------------------------
def fold_grow_tokens(params, set_input_size, dim_m):
    # TODO(synk): when dim_m >> 100 the fold inflates the streamed weight by
    # dim_m/100; in that regime keep w2 streamed and do the K=100 (pad->128)
    # grow_tokens matmul in-kernel instead of pre-folding.
    w1, b1, w2, b2, w3, b3 = params
    s10 = w2.shape[0]
    w23 = jnp.einsum('ksc,cm->ksm',
                     w2.reshape(s10, set_input_size, 100), w3,
                     precision=_HIGHEST).reshape(s10, set_input_size * dim_m)
    b23 = (jnp.dot(b2.reshape(set_input_size, 100), w3, precision=_HIGHEST)
           + b3).reshape(1, set_input_size * dim_m)
    # W23 is the dominant HBM stream -> bf16 (f32 accumulation in-kernel).
    return w1, b1, w23.astype(jnp.bfloat16), b23


# ---------------------------------------------------------------------------
# Deterministic parameter construction (weights stored as (in, out))
# ---------------------------------------------------------------------------
def init_params(key, dim_m, set_input_size, latent_size):
    k1, k2, k3, k4, k5, k6 = jax.random.split(key, 6)
    s10 = 10 * set_input_size
    s100 = 100 * set_input_size
    scale = 0.02
    w1 = scale * jax.random.normal(k1, (latent_size, s10), jnp.float32)
    b1 = scale * jax.random.normal(k2, (1, s10), jnp.float32)
    w2 = scale * jax.random.normal(k3, (s10, s100), jnp.float32)
    b2 = scale * jax.random.normal(k4, (1, s100), jnp.float32)
    w3 = scale * jax.random.normal(k5, (100, dim_m), jnp.float32)
    b3 = scale * jax.random.normal(k6, (1, dim_m), jnp.float32)
    return (w1, b1, w2, b2, w3, b3)


def reference_forward(latent, params):
    """Pure-JAX full-f32 reference reproducing the PyTorch semantics."""
    w1, b1, w2, b2, w3, b3 = params
    B = latent.shape[0]
    h = jnp.dot(latent, w1, precision=_HIGHEST) + b1
    h = jnp.dot(h, w2, precision=_HIGHEST) + b2
    h = h.reshape(B, -1, 100)
    return jnp.dot(h, w3, precision=_HIGHEST) + b3


def reference_forward_folded(latent, folded_params, dim_m):
    """XLA version of exactly the computation the kernel performs."""
    w1, b1, w23, b23 = folded_params
    B = latent.shape[0]
    h1 = (jnp.dot(latent, w1, precision=_HIGHEST) + b1).astype(jnp.bfloat16)
    out = jnp.dot(h1, w23, preferred_element_type=jnp.float32) + b23
    return out.reshape(B, -1, dim_m)


# ---------------------------------------------------------------------------
if __name__ == "__main__":
    # Small shapes consistent with the module's forward.
    batch = 2
    latent_size = 32
    set_input_size = 8      # -> sequence length 8, inner dims 80 and 800
    dim_m = 32

    key = jax.random.PRNGKey(0)
    pkey, xkey = jax.random.split(key)
    params = init_params(pkey, dim_m, set_input_size, latent_size)
    latent = jax.random.normal(xkey, (batch, latent_size), jnp.float32)

    folded = fold_grow_tokens(params, set_input_size, dim_m)
    out = latent_decoder_forward(latent, folded, dim_m)
    out = jax.block_until_ready(out)
    assert out.shape == (batch, set_input_size, dim_m), out.shape

    # Tight check: same bf16-weight computation done by XLA.
    ref_kernel_math = reference_forward_folded(latent, folded, dim_m)
    err_tight = float(jnp.max(jnp.abs(out - ref_kernel_math)))
    assert jnp.allclose(out, ref_kernel_math, atol=5e-5, rtol=1e-4), (
        f"kernel vs folded-bf16 XLA mismatch: {err_tight}")

    # Semantic check vs the full-f32 PyTorch-equivalent reference
    # (fold reorder + bf16 weights are only tolerance-equal, not bit-equal).
    ref_full = reference_forward(latent, params)
    err_full = float(jnp.max(jnp.abs(out - ref_full)))
    assert jnp.allclose(out, ref_full, atol=3e-3, rtol=3e-3), (
        f"kernel vs f32 reference mismatch: {err_full}")

    print("KERNEL_OK")
</pallas_src>

<mosaic_0001>
module attributes {stable_mosaic.version = 11 : i64} {
  func.func @fused_decoder_kernel(%arg0: i32, %arg1: i32, %arg2: memref<8x80xbf16, #tpu.memory_space<vmem>>, %arg3: memref<80x256xbf16, #tpu.memory_space<vmem>>, %arg4: memref<1x256xf32, #tpu.memory_space<vmem>>, %arg5: memref<8x256xf32, #tpu.memory_space<vmem>>) attributes {dimension_semantics = [#tpu.dimension_semantics<parallel>, #tpu.dimension_semantics<parallel>], iteration_bounds = array<i64: 1, 1>, scalar_prefetch = 0 : i64, scratch_operands = 0 : i64, tpu.core_type = #tpu.core_type<tc>, window_params = [{transform_indices = @transform_0, window_bounds = array<i64: 8, 80>}, {transform_indices = @transform_1, window_bounds = array<i64: 80, 256>}, {transform_indices = @transform_2, window_bounds = array<i64: 1, 256>}, {transform_indices = @transform_3, window_bounds = array<i64: 8, 256>}]} {
    %c0 = arith.constant 0 : index
    %c0_0 = arith.constant 0 : index
    %0 = vector.load %arg2[%c0, %c0_0] : memref<8x80xbf16, #tpu.memory_space<vmem>>, vector<8x80xbf16>
    %c0_1 = arith.constant 0 : index
    %c0_2 = arith.constant 0 : index
    %1 = vector.load %arg3[%c0_1, %c0_2] : memref<80x256xbf16, #tpu.memory_space<vmem>>, vector<80x256xbf16>
    %cst = arith.constant dense<0.000000e+00> : vector<8x256xf32>
    %2 = tpu.matmul %0, %1, %cst {dimension_numbers = #tpu.dot_dimension_numbers<[1], [0], [0], [1], [0, 0, 1, 1], [], []>} : vector<8x80xbf16>, vector<80x256xbf16>, vector<8x256xf32> -> vector<8x256xf32>
    %c0_3 = arith.constant 0 : index
    %c0_4 = arith.constant 0 : index
    %3 = vector.load %arg4[%c0_3, %c0_4] : memref<1x256xf32, #tpu.memory_space<vmem>>, vector<1x256xf32>
    %4 = vector.broadcast %3 : vector<1x256xf32> to vector<8x256xf32>
    %5 = arith.addf %2, %4 : vector<8x256xf32>
    %c0_5 = arith.constant 0 : index
    %c0_6 = arith.constant 0 : index
    %6 = vector.load %arg5[%c0_5, %c0_6] : memref<8x256xf32, #tpu.memory_space<vmem>>, vector<8x256xf32>
    tpu.vector_store %arg5[%c0_5, %c0_6], %5 {strides = array<i32>} : memref<8x256xf32, #tpu.memory_space<vmem>>, vector<8x256xf32>,
    return
  }
  func.func @transform_0(%arg0: i32, %arg1: i32) -> (i32, i32) {
    %c0_i32 = arith.constant 0 : i32
    %c0_i32_0 = arith.constant 0 : i32
    return %arg1, %c0_i32 : i32, i32
  }
  func.func @transform_1(%arg0: i32, %arg1: i32) -> (i32, i32) {
    %c0_i32 = arith.constant 0 : i32
    %c0_i32_0 = arith.constant 0 : i32
    return %c0_i32, %arg0 : i32, i32
  }
  func.func @transform_2(%arg0: i32, %arg1: i32) -> (i32, i32) {
    %c0_i32 = arith.constant 0 : i32
    %c0_i32_0 = arith.constant 0 : i32
    return %c0_i32, %arg0 : i32, i32
  }
  func.func @transform_3(%arg0: i32, %arg1: i32) -> (i32, i32) {
    %c0_i32 = arith.constant 0 : i32
    return %arg1, %arg0 : i32, i32
  }
}

</mosaic_0001>

<bundles_post_ra>
// kernel: tpu_custom_call.1
= control target key start
LH: loop header
LB: loop body
LE: loop exit
PB: predicated region body
PF: predicated region fallthrough
CT: control target
= control target key end

     0   :  { %8 = vsyncpa [#allocation3], 0  ;;  %s354_s0 = inlined_call_operand.hbm [shape: bf16[8,80], index: 0, kind: input, shape index: {}]   ;;  %s355_s1 = inlined_call_operand.hbm [shape: bf16[80,256], index: 1, kind: input, shape index: {}]   ;;  %s356_s2 = inlined_call_operand.vmem [shape: f32[1,256], index: 2, kind: input, shape index: {}]   ;;  %s357_s3 = inlined_call_operand.hbm [shape: f32[8,256], index: 3, kind: output, shape index: {}]  }
   0x1   :  { %9 = vsyncpa [#allocation6], 0 }
   0x2   :  { %10 = vsyncpa [#allocation4], 0  ;;  %s282_s12 = smov [#allocation2]   ;;  %s283_s14 = smov [#allocation5]  }
   0x3   :  { %s17_s13 = sshll.u32 %s282_s12, 4  ;;  %s26_s15 = sshll.u32 %s283_s14, 4  ;;  %s18_s13 = int_to_ptr.vmem [resolvable:$true] %s17_s13  ;;  %s308_s15 = int_to_ptr.vmem [resolvable:$true] %s26_s15 }
   0x4   :  { %s210_s18 = scalar_lea.hbm %s354_s0, 64 }
   0x5   :  { %p211_p0 = scmp.ne.s32.totalorder %s354_s0, %s210_s18  ;;  %p214_p1 = scmp.lt.u32.totalorder %s210_s18, %s354_s0 }
   0x7   :  { %p216_p2 = pnand %p214_p1, %p211_p0 }
   0x9   :  { %219 = shalt.err (!%p216_p2)
}
   0xa   :  { %s220_s23 = scalar_lea.vmem %s18_s13, 64  ;;  %p225_p4 = scmp.lt.s32.totalorder %s18_s13, %s18_s13 }
   0xb   :  { %p221_p3 = scmp.ne.s32.totalorder %s18_s13, %s220_s23  ;;  %p226_p5 = scmp.lt.s32.totalorder %s220_s23, %s220_s23 }
   0xd   :  { %p227_p6 = por %p226_p5, %p225_p4 }
   0xf   :  { %p228_p7 = pnand %p227_p6, %p221_p3 }
  0x11   :  { %231 = shalt.err (!%p228_p7)
}
  0x12   :  { %20 = dma.hbm_to_vmem [thread:$0]  %s354_s0, 64, %s18_s13, [#allocation3]  }
  0x13   :  { %s232_s28 = scalar_lea.hbm %s355_s1, 1280 }
  0x14   :  { %p233_p8 = scmp.ne.s32.totalorder %s355_s1, %s232_s28  ;;  %p236_p9 = scmp.lt.u32.totalorder %s232_s28, %s355_s1 }
  0x16   :  { %p238_p10 = pnand %p236_p9, %p233_p8 }
  0x18   :  { %241 = shalt.err (!%p238_p10)
}
  0x19   :  { %s242_s6 = scalar_lea.vmem %s308_s15, 1280  ;;  %p247_p12 = scmp.lt.s32.totalorder %s308_s15, %s308_s15 }
  0x1a   :  { %p243_p11 = scmp.ne.s32.totalorder %s308_s15, %s242_s6  ;;  %p248_p13 = scmp.lt.s32.totalorder %s242_s6, %s242_s6 }
  0x1c   :  { %p249_p0 = por %p248_p13, %p247_p12 }
  0x1e   :  { %p250_p1 = pnand %p249_p0, %p243_p11 }
  0x20   :  { %253 = shalt.err (!%p250_p1)
}
  0x21   :  { %s284_s0 = smov 128   ;;  %s285_s7 = smov 8  }
  0x22   :  { %32 = dma.hbm_to_vmem [thread:$0]  %s355_s1, 1280, %s308_s15, [#allocation6], %s284_s0, %s284_s0, %s285_s7  }
  0x23   :  { %276 = dma.done.wait [#allocation3], 64  }
  0x24   :  { %277 = vsyncadd [#allocation3], 4294967232 }
  0x25   :  { %278 = dma.done.wait [#allocation6], 1280  }
  0x26   :  { %279 = vsyncadd [#allocation6], 4294966016  ;;  %v286_v0 = vmov 0   ;;  %v195_v1 = vld [vmem:[#allocation5 + $0x4] ss:$8 sps:$4 sm:$0xff]   ;;  %vm115_vm0 = vcmask 654336   ;;  %v55_v12 = vlaneseq }
  0x27   :  { %151 = vmatprep.mubr.bf16.mxu0 %v286_v0  ;;  %v197_v2 = vld [vmem:[#allocation5] ss:$8 sps:$4 sm:$0xff]   ;;  %119 = vmatprep.subr.bf16.mxu0 %v195_v1  ;;  %v198_v3 = vld [vmem:[#allocation5 + $0x14] ss:$8 sps:$4 sm:$0xff]   ;;  %v200_v4 = vld [vmem:[#allocation5 + $0x10] ss:$8 sps:$4 sm:$0xff]  }
  0x28   :  { %120 = vmatpush1.bf16.msra.mxu0 %v197_v2  ;;  %v201_v5 = vld [vmem:[#allocation5 + $0x24] ss:$8 sps:$4 sm:$0xff]   ;;  %v203_v6 = vld [vmem:[#allocation5 + $0x20] ss:$8 sps:$4 sm:$0xff]   ;;  %v204_v7 = vld [vmem:[#allocation5 + $0x34] ss:$8 sps:$4 sm:$0xff]  }
  0x29   :  { %121 = vmatprep.subr.bf16.mxu0 %v198_v3  ;;  %v206_v8 = vld [vmem:[#allocation5 + $0x30] ss:$8 sps:$4 sm:$0xff]   ;;  %v207_v9 = vld [vmem:[#allocation5 + $0x44] ss:$8 sps:$4 sm:$0xff]   ;;  %v209_v10 = vld [vmem:[#allocation5 + $0x40] ss:$8 sps:$4 sm:$0xff]  }
  0x2a   :  { %v42_v11 = vld [vmem:[#allocation2] sm:$0xf]  ;;  %v56_v13 = vshrl.u32 %v55_v12, 7  ;;  %s287_s11 = smov [#allocation7]  }
  0x2b   :  { %v53_v15 = vld [vmem:[%s356_s2] sm:$0x3]  ;;  %s168_s12 = sshll.u32 %s287_s11, 4  ;;  %s169_s12 = int_to_ptr.vmem [resolvable:$true] %s168_s12 }
  0x2c   :  { %122 = vmatpush1.bf16.msra.mxu0 %v200_v4  ;;  %v57_v14 = vsub.s32 0, %v56_v13  ;;  %v61_v16 = vsub.s32 1, %v56_v13  ;;  %s254_s13 = scalar_lea.vmem %s169_s12, 256  ;;  %p259_p3 = scmp.lt.s32.totalorder %s169_s12, %s169_s12 }
  0x2d   :  { %123 = vmatprep.subr.bf16.mxu0 %v201_v5  ;;  %p255_p2 = scmp.ne.s32.totalorder %s169_s12, %s254_s13  ;;  %p260_p4 = scmp.lt.s32.totalorder %s254_s13, %s254_s13 }
  0x2e   :  { %v58_v17 = vrot.slane %v53_v15, %v57_v14  ;;  %v62_v18 = vrot.slane %v53_v15, %v61_v16 }
  0x2f   :  { %p261_p5 = por %p260_p4, %p259_p3 }
  0x30   :  { %124 = vmatpush1.bf16.msra.mxu0 %v203_v6 }
  0x31   :  { %125 = vmatprep.subr.bf16.mxu0 %v204_v7  ;;  %p262_p6 = pnand %p261_p5, %p255_p2 }
  0x34   :  { %126 = vmatpush1.bf16.msra.mxu0 %v206_v8 }
  0x35   :  { %127 = vmatprep.subr.bf16.mxu0 %v207_v9 }
  0x38   :  { %128 = vmatpush1.bf16.msra.mxu0 %v209_v10 }
  0x3b   :  { %188 = vmatmul.mubr.msk.bf16.vlgmr.msra.gmra.mrb[0].mxu0 %vm115_vm0, %v42_v11 }
 0x10e   :  { %v153_v19 = vpop.f32.mrb[0].mxu0 }
 0x10f   :  { %v154_v20 = vadd.f32 %v153_v19, %v58_v17  ;;  %v155_v21 = vpop.f32.mrb[1].mxu0 }
 0x110   :  { %v156_v22 = vadd.f32 %v155_v21, %v62_v18  ;;  %v157_v23 = vpop.f32.mrb[2].mxu0 }
 0x111   :  { %160 = vst [vmem:[#allocation7] sm:$0xff] %v154_v20  ;;  %v158_v24 = vpop.f32.mrb[3].mxu0 }
 0x112   :  { %161 = vst [vmem:[#allocation7 + $0x8] sm:$0xff] %v156_v22 }
 0x113   :  { %265 = shalt.err (!%p262_p6)
}
 0x114   :  { %s266_s15 = scalar_lea.hbm %s357_s3, 256 }
 0x115   :  { %p267_p7 = scmp.ne.s32.totalorder %s357_s3, %s266_s15  ;;  %p270_p8 = scmp.lt.u32.totalorder %s266_s15, %s357_s3 }
 0x117   :  { %p272_p9 = pnand %p270_p8, %p267_p7 }
 0x119   :  { %275 = shalt.err (!%p272_p9)
}
 0x11a   :  { %171 = dma.vmem_to_hbm [thread:$0]  %s169_s12, 256, %s357_s3, [#allocation4]  }
 0x11b   :  { %280 = dma.done.wait [#allocation4], 256  }
 0x11c   :  { %281 = vsyncadd [#allocation4], 4294967040 }
 0x11d   :  { %175 = vsyncpa [#allocation3], 1 }
 0x11e   :  { %176 = vsyncpa [#allocation6], 1 }
 0x11f   :  { %177 = vsyncpa [#allocation4], 1 }

</bundles_post_ra>
